<compile_context>
chip_gen: v6e
topology: v6e:2x2x1
jax: 0.10.0
libtpu: 0.0.40
codegen_flags: <defaults>
</compile_context>

<pallas_src>
import jax
import jax.numpy as jnp
from jax import lax
from jax.experimental import pallas as pl
from jax.experimental.pallas import tpu as pltpu

LANE = 128      # vreg lane width
SUBLANE = 8     # vreg sublane count (f32)


def _round_up(x, m):
    return ((x + m - 1) // m) * m


# --------------------------------------------------------------------------
# Kernel: one batch tile of the fused Actor forward (mu only).
# --------------------------------------------------------------------------
def actor_mu_kernel(obs_ref, w1_ref, b1_ref, wf_ref, bf_ref, mu_ref):
    # Hidden layer 1: Linear + ReLU   (MXU matmul, f32 accumulate)
    h1 = jnp.dot(obs_ref[...], w1_ref[...], preferred_element_type=jnp.float32)
    h1 = jnp.maximum(h1 + b1_ref[...], 0.0)

    # Fused (layer2 o mu head): mu = h1 @ (W2 @ Wmu) + (b2 @ Wmu + bmu).
    # wf/bf are zero-padded to 128 lanes for the MXU; only the first act_dim
    # columns are written back (HBM output stays act_dim-wide).
    mu = jnp.dot(h1, wf_ref[...], preferred_element_type=jnp.float32) + bf_ref[...]
    act_dim = mu_ref.shape[-1]
    mu_ref[...] = mu[:, :act_dim].astype(mu_ref.dtype)


# --------------------------------------------------------------------------
# Parameter construction / preparation
# --------------------------------------------------------------------------
def init_actor_params(key, obs_dim, act_dim, hidden_sizes):
    """Deterministic, PyTorch-Linear-like init (uniform +-1/sqrt(fan_in)).

    Matches the Actor with exactly two hidden layers (ReLU, then Identity)."""
    sizes = [obs_dim] + list(hidden_sizes)
    params = {}
    keys = jax.random.split(key, 3)

    def linear(k, fan_in, fan_out):
        kw, kb = jax.random.split(k)
        bound = 1.0 / jnp.sqrt(fan_in)
        # stored as (in, out) so the kernel computes x @ W
        w = jax.random.uniform(kw, (fan_in, fan_out), jnp.float32, -bound, bound)
        b = jax.random.uniform(kb, (1, fan_out), jnp.float32, -bound, bound)
        return w, b

    params["w1"], params["b1"] = linear(keys[0], sizes[0], sizes[1])
    params["w2"], params["b2"] = linear(keys[1], sizes[1], sizes[2])
    params["wmu"], params["bmu"] = linear(keys[2], sizes[2], act_dim)
    params["log_std"] = jnp.zeros((1, act_dim), jnp.float32)  # nn.Parameter(torch.zeros)
    return params


def prepare_actor_params(params):
    """One-time prep: fuse the Identity-activated Linear into the mu head and
    zero-pad the fused weight/bias to a lane-dense 128 columns (MXU input only;
    the HBM output stays act_dim-wide)."""
    act_dim = params["wmu"].shape[1]
    hi = lax.Precision.HIGHEST  # exact f32 fusion so results match the unfused chain
    wf = jnp.dot(params["w2"], params["wmu"], precision=hi)                      # (h1, act)
    bf = jnp.dot(params["b2"], params["wmu"], precision=hi) + params["bmu"]      # (1, act)
    out_pad = _round_up(max(act_dim, LANE), LANE)
    wf = jnp.pad(wf, ((0, 0), (0, out_pad - act_dim)))
    bf = jnp.pad(bf, ((0, 0), (0, out_pad - act_dim)))
    return {
        "w1": params["w1"], "b1": params["b1"],
        "wf": wf, "bf": bf,
        "log_std": params["log_std"],
        "act_dim": act_dim,
    }


# --------------------------------------------------------------------------
# Wrapper
# --------------------------------------------------------------------------
def actor_forward(obs, fused, *, batch_tile=4096):
    """Actor forward pass. obs: (B, obs_dim) f32. Returns (mu (B, act), std (act,))."""
    B, obs_dim = obs.shape
    act_dim = fused["act_dim"]
    h1 = fused["w1"].shape[1]
    wf_cols = fused["wf"].shape[1]

    # Batch-tile selection:
    #  * huge batches: tile at batch_tile rows (sublane-rounded), software-
    #    pipelined over the grid;
    #  * moderate batches (>=256 rows): split into >=2 tiles so the "parallel"
    #    batch axis shards across v7x's two TensorCores;
    #  * small batches: one (sublane-rounded) tile.
    # No explicit padding of obs / slicing of mu: Pallas masks the partial
    # last block (safe: every mu row depends only on its own obs row).
    if B > batch_tile:
        tb = _round_up(batch_tile, SUBLANE)
    elif B >= 256:
        tb = _round_up(-(-B // 2), SUBLANE)
    else:
        tb = max(SUBLANE, _round_up(B, SUBLANE))
    grid = (pl.cdiv(B, tb),)

    # Advisory cost estimate so XLA can overlap this small mem-bound kernel
    # with surrounding ops.
    flops = 2 * B * (obs_dim * h1 + h1 * act_dim)
    bytes_accessed = 4 * (B * (obs_dim + act_dim)            # obs in + mu out
                          + obs_dim * h1 + h1                # W1, b1
                          + h1 * wf_cols + wf_cols)          # wf, bf

    # TODO(synk): pipeline_mode=pl.Buffered(1) on the constant weight specs
    # would shave ~tens of KiB of double-buffered VMEM; omitted (negligible
    # benefit at this footprint, avoids any compile-compat risk).
    mu = pl.pallas_call(
        actor_mu_kernel,
        out_shape=jax.ShapeDtypeStruct((B, act_dim), jnp.float32),
        grid=grid,
        in_specs=[
            pl.BlockSpec((tb, obs_dim), lambda i: (i, 0)),       # obs: tiled over batch
            pl.BlockSpec((obs_dim, h1), lambda i: (0, 0)),        # W1: VMEM-resident
            pl.BlockSpec((1, h1), lambda i: (0, 0)),              # b1: VMEM-resident
            pl.BlockSpec((h1, wf_cols), lambda i: (0, 0)),        # fused W: VMEM-resident
            pl.BlockSpec((1, wf_cols), lambda i: (0, 0)),         # fused b: VMEM-resident
        ],
        out_specs=pl.BlockSpec((tb, act_dim), lambda i: (i, 0)),  # act_dim-wide mu tile
        compiler_params=pltpu.CompilerParams(
            dimension_semantics=("parallel",),                    # megacore on v7x
        ),
        cost_estimate=pl.CostEstimate(
            flops=flops, transcendentals=0, bytes_accessed=bytes_accessed),
    )(obs, fused["w1"], fused["b1"], fused["wf"], fused["bf"])

    # std = exp(log_std): batch-independent, act_dim elements -> plain JAX
    # (one fewer input + output DMA per call).
    std = jnp.exp(fused["log_std"]).reshape(-1)
    return mu, std


# --------------------------------------------------------------------------
# Plain-JAX reference (mirrors the PyTorch module exactly, unfused)
# --------------------------------------------------------------------------
def actor_forward_ref(obs, params):
    h1 = jnp.maximum(obs @ params["w1"] + params["b1"], 0.0)
    h2 = h1 @ params["w2"] + params["b2"]          # Identity output activation
    mu = h2 @ params["wmu"] + params["bmu"]
    std = jnp.exp(params["log_std"]).reshape(-1)
    return mu, std


if __name__ == "__main__":
    obs_dim, act_dim = 16, 4
    hidden_sizes = (32, 32)

    key = jax.random.PRNGKey(0)
    k_params, k_obs1, k_obs2 = jax.random.split(key, 3)

    params = init_actor_params(k_params, obs_dim, act_dim, hidden_sizes)
    fused = prepare_actor_params(params)

    # --- small batch: single tile, single grid step -------------------------
    batch = 8
    obs = jax.random.normal(k_obs1, (batch, obs_dim), jnp.float32)
    mu, std = jax.block_until_ready(actor_forward(obs, fused))
    mu_ref, std_ref = actor_forward_ref(obs, params)

    assert mu.shape == (batch, act_dim)
    assert std.shape == (act_dim,)
    assert jnp.allclose(mu, mu_ref, atol=2e-5, rtol=2e-5)
    assert jnp.allclose(std, std_ref, atol=1e-6, rtol=1e-6)

    # --- larger, non-divisible batch: multi-step grid + masked partial block -
    batch2 = 300
    obs2 = jax.random.normal(k_obs2, (batch2, obs_dim), jnp.float32)
    mu2, std2 = jax.block_until_ready(actor_forward(obs2, fused, batch_tile=128))
    mu2_ref, _ = actor_forward_ref(obs2, params)

    assert mu2.shape == (batch2, act_dim)
    assert jnp.allclose(mu2, mu2_ref, atol=2e-5, rtol=2e-5)
    assert jnp.allclose(std2, std_ref, atol=1e-6, rtol=1e-6)

    # --- mid-size batch (>=256): exercises the 2-tile split for v7x megacore -
    batch3 = 260
    obs3 = jax.random.normal(jax.random.PRNGKey(3), (batch3, obs_dim), jnp.float32)
    mu3, _ = jax.block_until_ready(actor_forward(obs3, fused))
    mu3_ref, _ = actor_forward_ref(obs3, params)

    assert mu3.shape == (batch3, act_dim)
    assert jnp.allclose(mu3, mu3_ref, atol=2e-5, rtol=2e-5)

    print("KERNEL_OK")
</pallas_src>

<mosaic_0001>
module attributes {stable_mosaic.version = 11 : i64} {
  func.func @actor_mu_kernel(%arg0: i32, %arg1: memref<8x16xf32, #tpu.memory_space<vmem>>, %arg2: memref<16x32xf32, #tpu.memory_space<vmem>>, %arg3: memref<1x32xf32, #tpu.memory_space<vmem>>, %arg4: memref<32x128xf32, #tpu.memory_space<vmem>>, %arg5: memref<1x128xf32, #tpu.memory_space<vmem>>, %arg6: memref<8x4xf32, #tpu.memory_space<vmem>>) attributes {dimension_semantics = [#tpu.dimension_semantics<parallel>], iteration_bounds = array<i64: 1>, scalar_prefetch = 0 : i64, scratch_operands = 0 : i64, tpu.core_type = #tpu.core_type<tc>, window_params = [{transform_indices = @transform_0, window_bounds = array<i64: 8, 16>}, {pipeline_mode = #tpu.pipeline_mode<synchronous>, transform_indices = @transform_1, window_bounds = array<i64: 16, 32>}, {pipeline_mode = #tpu.pipeline_mode<synchronous>, transform_indices = @transform_2, window_bounds = array<i64: 1, 32>}, {pipeline_mode = #tpu.pipeline_mode<synchronous>, transform_indices = @transform_3, window_bounds = array<i64: 32, 128>}, {pipeline_mode = #tpu.pipeline_mode<synchronous>, transform_indices = @transform_4, window_bounds = array<i64: 1, 128>}, {transform_indices = @transform_5, window_bounds = array<i64: 8, 4>}]} {
    %c0 = arith.constant 0 : index
    %c0_0 = arith.constant 0 : index
    %0 = vector.load %arg1[%c0, %c0_0] : memref<8x16xf32, #tpu.memory_space<vmem>>, vector<8x16xf32>
    %c0_1 = arith.constant 0 : index
    %c0_2 = arith.constant 0 : index
    %1 = vector.load %arg2[%c0_1, %c0_2] : memref<16x32xf32, #tpu.memory_space<vmem>>, vector<16x32xf32>
    %cst = arith.constant dense<0.000000e+00> : vector<8x32xf32>
    %2 = tpu.matmul %0, %1, %cst {dimension_numbers = #tpu.dot_dimension_numbers<[1], [0], [0], [1], [0, 0, 1, 1], [], []>} : vector<8x16xf32>, vector<16x32xf32>, vector<8x32xf32> -> vector<8x32xf32>
    %c0_3 = arith.constant 0 : index
    %c0_4 = arith.constant 0 : index
    %3 = vector.load %arg3[%c0_3, %c0_4] : memref<1x32xf32, #tpu.memory_space<vmem>>, vector<1x32xf32>
    %4 = vector.broadcast %3 : vector<1x32xf32> to vector<8x32xf32>
    %5 = arith.addf %2, %4 : vector<8x32xf32>
    %cst_5 = arith.constant 0.000000e+00 : f32
    %6 = vector.broadcast %cst_5 : f32 to vector<8x32xf32>
    %7 = arith.maximumf %5, %6 : vector<8x32xf32>
    %c0_6 = arith.constant 0 : index
    %c0_7 = arith.constant 0 : index
    %8 = vector.load %arg4[%c0_6, %c0_7] : memref<32x128xf32, #tpu.memory_space<vmem>>, vector<32x128xf32>
    %cst_8 = arith.constant dense<0.000000e+00> : vector<8x128xf32>
    %9 = tpu.matmul %7, %8, %cst_8 {dimension_numbers = #tpu.dot_dimension_numbers<[1], [0], [0], [1], [0, 0, 1, 1], [], []>} : vector<8x32xf32>, vector<32x128xf32>, vector<8x128xf32> -> vector<8x128xf32>
    %c0_9 = arith.constant 0 : index
    %c0_10 = arith.constant 0 : index
    %10 = vector.load %arg5[%c0_9, %c0_10] : memref<1x128xf32, #tpu.memory_space<vmem>>, vector<1x128xf32>
    %11 = vector.broadcast %10 : vector<1x128xf32> to vector<8x128xf32>
    %12 = arith.addf %9, %11 : vector<8x128xf32>
    %13 = vector.extract_strided_slice %12 {offsets = [0, 0], sizes = [8, 4], strides = [1, 1]} : vector<8x128xf32> to vector<8x4xf32>
    %c0_11 = arith.constant 0 : index
    %c0_12 = arith.constant 0 : index
    %14 = vector.load %arg6[%c0_11, %c0_12] : memref<8x4xf32, #tpu.memory_space<vmem>>, vector<8x4xf32>
    tpu.vector_store %arg6[%c0_11, %c0_12], %13 {strides = array<i32>} : memref<8x4xf32, #tpu.memory_space<vmem>>, vector<8x4xf32>,
    return
  }
  func.func @transform_0(%arg0: i32) -> (i32, i32) {
    %c0_i32 = arith.constant 0 : i32
    %c0_i32_0 = arith.constant 0 : i32
    return %arg0, %c0_i32 : i32, i32
  }
  func.func @transform_1(%arg0: i32) -> (i32, i32) {
    %c0_i32 = arith.constant 0 : i32
    %c0_i32_0 = arith.constant 0 : i32
    %c0_i32_1 = arith.constant 0 : i32
    return %c0_i32, %c0_i32_0 : i32, i32
  }
  func.func @transform_2(%arg0: i32) -> (i32, i32) {
    %c0_i32 = arith.constant 0 : i32
    %c0_i32_0 = arith.constant 0 : i32
    %c0_i32_1 = arith.constant 0 : i32
    return %c0_i32, %c0_i32_0 : i32, i32
  }
  func.func @transform_3(%arg0: i32) -> (i32, i32) {
    %c0_i32 = arith.constant 0 : i32
    %c0_i32_0 = arith.constant 0 : i32
    %c0_i32_1 = arith.constant 0 : i32
    return %c0_i32, %c0_i32_0 : i32, i32
  }
  func.func @transform_4(%arg0: i32) -> (i32, i32) {
    %c0_i32 = arith.constant 0 : i32
    %c0_i32_0 = arith.constant 0 : i32
    %c0_i32_1 = arith.constant 0 : i32
    return %c0_i32, %c0_i32_0 : i32, i32
  }
  func.func @transform_5(%arg0: i32) -> (i32, i32) {
    %c0_i32 = arith.constant 0 : i32
    %c0_i32_0 = arith.constant 0 : i32
    return %arg0, %c0_i32 : i32, i32
  }
}

</mosaic_0001>

<bundles_post_ra>
// kernel: tpu_custom_call.1
= control target key start
LH: loop header
LB: loop body
LE: loop exit
PB: predicated region body
PF: predicated region fallthrough
CT: control target
= control target key end

     0   :  { %10 = vsyncpa [#allocation3], 0  ;;  %s393_s0 = inlined_call_operand.hbm [shape: f32[8,16], index: 0, kind: input, shape index: {}]   ;;  %s394_s1 = inlined_call_operand.hbm [shape: f32[16,32], index: 1, kind: input, shape index: {}]   ;;  %s395_s2 = inlined_call_operand.vmem [shape: f32[1,32], index: 2, kind: input, shape index: {}]   ;;  %s396_s3 = inlined_call_operand.hbm [shape: f32[32,128], index: 3, kind: input, shape index: {}]   ;;  %s397_s4 = inlined_call_operand.vmem [shape: f32[1,128], index: 4, kind: input, shape index: {}]   ;;  %s398_s5 = inlined_call_operand.vmem [shape: f32[8,4], index: 5, kind: output, shape index: {}]  }
   0x1   :  { %11 = vsyncpa [#allocation5], 0  ;;  %s338_s18 = smov [#allocation4]  }
   0x2   :  { %s27_s19 = sshll.u32 %s338_s18, 4  ;;  %s28_s19 = int_to_ptr.vmem [resolvable:$true] %s27_s19 }
   0x3   :  { %s282_s20 = scalar_lea.vmem %s28_s19, 256  ;;  %p287_p1 = scmp.lt.s32.totalorder %s28_s19, %s28_s19 }
   0x4   :  { %p283_p0 = scmp.ne.s32.totalorder %s28_s19, %s282_s20  ;;  %p288_p2 = scmp.lt.s32.totalorder %s282_s20, %s282_s20 }
   0x6   :  { %p289_p3 = por %p288_p2, %p287_p1 }
   0x8   :  { %p290_p4 = pnand %p289_p3, %p283_p0 }
   0xa   :  { %293 = shalt.err (!%p290_p4)
}
   0xb   :  { %s339_s21 = smov 128   ;;  %s340_s22 = smov 8  }
   0xc   :  { %33 = dma.hbm_to_vmem [thread:$0]  %s394_s1, 256, %s28_s19, [#allocation5], %s339_s21, %s339_s21, %s340_s22  }
   0xd   :  { %s341_s25 = smov [#allocation2]   ;;  %s342_s27 = smov [#allocation6]  }
   0xe   :  { %s18_s26 = sshll.u32 %s341_s25, 4  ;;  %s41_s28 = sshll.u32 %s342_s27, 4  ;;  %s19_s26 = int_to_ptr.vmem [resolvable:$true] %s18_s26  ;;  %s42_s28 = int_to_ptr.vmem [resolvable:$true] %s41_s28 }
   0xf   :  { %s302_s29 = scalar_lea.vmem %s19_s26, 128  ;;  %p307_p6 = scmp.lt.s32.totalorder %s19_s26, %s19_s26 }
  0x10   :  { %p303_p5 = scmp.ne.s32.totalorder %s19_s26, %s302_s29  ;;  %p308_p7 = scmp.lt.s32.totalorder %s302_s29, %s302_s29 }
  0x12   :  { %p309_p8 = por %p308_p7, %p307_p6 }
  0x14   :  { %p310_p9 = pnand %p309_p8, %p303_p5 }
  0x16   :  { %313 = shalt.err (!%p310_p9)
}
  0x17   :  { %21 = dma.hbm_to_vmem [thread:$0]  %s393_s0, 128, %s19_s26, [#allocation3]  }
  0x18   :  { %s322_s7 = scalar_lea.vmem %s42_s28, 512  ;;  %p327_p11 = scmp.lt.s32.totalorder %s42_s28, %s42_s28 }
  0x19   :  { %p323_p10 = scmp.ne.s32.totalorder %s42_s28, %s322_s7  ;;  %p328_p12 = scmp.lt.s32.totalorder %s322_s7, %s322_s7 }
  0x1b   :  { %p329_p13 = por %p328_p12, %p327_p11 }
  0x1d   :  { %p330_p0 = pnand %p329_p13, %p323_p10 }
  0x1f   :  { %333 = shalt.err (!%p330_p0)
}
  0x20   :  { %47 = dma.hbm_to_vmem [thread:$0]  %s396_s3, 512, %s42_s28, [#allocation5], %s339_s21, %s339_s21, %s340_s22  }
  0x21   :  { %334 = dma.done.wait [#allocation3], 128  }
  0x22   :  { %335 = vsyncadd [#allocation3], 4294967168 }
  0x23   :  { %336 = dma.done.wait [#allocation5], 768  }
  0x24   :  { %337 = vsyncadd [#allocation5], 4294966528  ;;  %v343_v0 = vmov 0.0   ;;  %vm344_vm0 = vmmov 0   ;;  %v61_v1 = vld [vmem:[#allocation4 + $0x8] sm:$0xff]  ;;  %v60_v2 = vld [vmem:[#allocation4] sm:$0xff] }
  0x25   :  { %249 = vmatprep.subr.mxu0 %v343_v0  ;;  %253 = vmatprep.mubr.msk.f32.mxu0 %vm344_vm0, %v343_v0  ;;  %v59_v3 = vld [vmem:[#allocation2] sm:$0xff]  ;;  %vm69_vm1 = vcmask 130048   ;;  %v147_v4 = vld [vmem:[#allocation6 + $0x18] sm:$0xff]  ;;  %v146_v5 = vld [vmem:[#allocation6 + $0x10] sm:$0xff]  ;;  %vm155_vm2 = vcmask 261120   ;;  %vm229_vm3 = vcmask 31744  }
  0x26   :  { %256 = vmatprep.subr.mxu1 %v343_v0  ;;  %264 = vmatprep.mubr.msk.f32.mxu1 %vm344_vm0, %v343_v0  ;;  %v145_v6 = vld [vmem:[#allocation6 + $0x8] sm:$0xff]  ;;  %v144_v7 = vld [vmem:[#allocation6] sm:$0xff] }
  0x27   :  { %250 = vmatpush3.msra.mxu0 %v61_v1  ;;  %257 = vmatpush3.msra.mxu1 %v147_v4  ;;  %v237_v8 = vld [vmem:[%s395_s2] ss:$0 sm:$0xff] }
  0x28   :  { %251 = vmatprep.subr.mxu0 %v343_v0  ;;  %258 = vmatprep.subr.mxu1 %v343_v0  ;;  %v239_v13 = vld [vmem:[%s397_s4] ss:$0 sm:$0xff] }
  0x29   :  { %252 = vmatpush3.msra.mxu0 %v60_v2  ;;  %259 = vmatpush3.msra.mxu1 %v146_v5 }
  0x2a   :  { %254 = vmatmul.mubr.msk.f32.vlgmr.msra.gmra.mxu0 %vm69_vm1, %v59_v3  ;;  %260 = vmatprep.subr.mxu1 %v343_v0 }
  0x2b   :  { %261 = vmatpush3.msra.mxu1 %v145_v6 }
  0x2c   :  { %262 = vmatprep.subr.mxu1 %v343_v0 }
  0x2d   :  { %263 = vmatpush3.msra.mxu1 %v144_v7 }
  0xea   :  { %v139_v9 = vpop.f32.mrf.mxu0 }
  0xeb   :  { %v140_v10 = vadd.f32 %v237_v8, %v139_v9 }
  0xec   :  { %v255_v11 = vpop.f32.mrf.mxu0 }
  0xed   :  { %v143_v12 = vmax.f32 %v140_v10, 0.0 }
  0xef   :  { %265 = vmatmul.mubr.msk.f32.vlgmr.msra.gmra.mxu1 %vm155_vm2, %v143_v12 }
 0x1af   :  { %v225_v14 = vpop.f32.mrf.mxu1 }
 0x1b0   :  { %v226_v15 = vadd.f32 %v239_v13, %v225_v14 }
 0x1b1   :  { %v266_v16 = vpop.f32.mrf.mxu1 }
 0x1b2   :  { %230 = vst.msk [vmem:[%s398_s5] sm:$0xff] %vm229_vm3, %v226_v15 }
 0x1b3   :  { %235 = vsyncpa [#allocation3], 1 }
 0x1b4   :  { %236 = vsyncpa [#allocation5], 1 }

</bundles_post_ra>
